<compile_context>
chip_gen: v6e
topology: v6e:2x2x1
jax: 0.10.0
libtpu: 0.0.40
codegen_flags: <defaults>
</compile_context>

<pallas_src>
import jax
import jax.numpy as jnp
from jax.experimental import pallas as pl
from jax.experimental.pallas import tpu as pltpu
from typing import List


# --- activation registry (mirrors non_linearity_guard) -----------------------
_ACTIVATIONS = {
    "relu": lambda x: jnp.maximum(x, 0.0),
    "tanh": jnp.tanh,
    "sigmoid": jax.nn.sigmoid,
    "identity": lambda x: x,
}

_LANE = 128        # feature dims padded to a multiple of this
_SUBLANE = 8       # batch tiles are multiples of this (f32 sublane)
_MAX_TILE_B = 1024 # largest batch tile considered (VMEM check may shrink it)


def _round_up(x: int, m: int) -> int:
    return ((x + m - 1) // m) * m


def _pick_div(total: int, candidates) -> int:
    for c in candidates:
        if c <= total and total % c == 0:
            return c
    return total


def _vmem_budget_bytes() -> int:
    """Generation-aware usable-VMEM budget (leave headroom for compiler scratch)."""
    try:
        cap = int(pltpu.get_tpu_info().vmem_capacity_bytes)
    except Exception:
        cap = 64 * 1024 * 1024  # conservative default (v7x-sized)
    headroom = max(20 * 1024 * 1024, cap // 4)
    return max(16 * 1024 * 1024, cap - headroom)   # ~96 MiB @128, ~44 MiB @64


# --- kernels ------------------------------------------------------------------
def _make_fused_mlp_kernel(activations: List[str], compute_dtype):
    """All Linear+activation layers fused; weights stay VMEM-resident.

    Matmuls are fed in compute_dtype (bf16 by default) with f32 MXU
    accumulation; bias add + nonlinearities run in f32 on the VPU/EUP."""
    n_lin = len(activations)

    def kernel(*refs):
        # refs = (x_ref, w1_ref, b1_ref, ..., wn_ref, bn_ref, out_ref)
        x_ref = refs[0]
        o_ref = refs[-1]
        h = x_ref[...]
        for i in range(n_lin):
            w_ref = refs[1 + 2 * i]
            b_ref = refs[2 + 2 * i]
            h = jnp.dot(h.astype(compute_dtype), w_ref[...],
                        preferred_element_type=jnp.float32)
            h = h + b_ref[...].astype(jnp.float32)        # (tb, n) + (1, n)
            h = _ACTIVATIONS[activations[i]](h)
        o_ref[...] = h.astype(o_ref.dtype)

    return kernel


def _make_layer_kernel(activation: str, compute_dtype):
    """Single Linear+activation layer, tiled over (batch, N, K) with f32 acc."""

    def kernel(x_ref, w_ref, b_ref, o_ref, acc_ref):
        k = pl.program_id(2)

        @pl.when(k == 0)
        def _():
            acc_ref[...] = jnp.zeros_like(acc_ref)

        acc_ref[...] += jnp.dot(x_ref[...].astype(compute_dtype), w_ref[...],
                                preferred_element_type=jnp.float32)

        @pl.when(k == pl.num_programs(2) - 1)
        def _():
            h = acc_ref[...] + b_ref[...].astype(jnp.float32)
            o_ref[...] = _ACTIVATIONS[activation](h).astype(o_ref.dtype)

    return kernel


# --- module -------------------------------------------------------------------
class GenericFeedForwardNetworkPallas:
    """JAX/Pallas equivalent of the PyTorch GenericFeedForwardNetwork."""

    def __init__(self, n_layers: int, activations: List[str],
                 nodes_per_layer: List[int], key: jax.Array,
                 compute_dtype=jnp.bfloat16, out_dtype=jnp.float32,
                 force_layered: bool = False) -> None:
        assert n_layers >= 2, (
            "The feed forward network must have at least an input and output layer")
        assert n_layers - 1 == len(activations), (
            "activation information doesn't match number of layers")
        assert n_layers == len(nodes_per_layer), (
            "node information doesn't match number of layers")
        for a in activations:
            assert a in _ACTIVATIONS, f"unsupported activation: {a}"

        self.n_layers = n_layers
        self.activations = list(activations)
        self.nodes_per_layer = list(nodes_per_layer)
        self.compute_dtype = compute_dtype
        self.out_dtype = out_dtype
        self._vmem_budget = _vmem_budget_bytes()
        # lane-dense padded feature dims (multiples of 128) for hidden/output
        self.padded_dims = [_round_up(d, _LANE) for d in nodes_per_layer]

        # Deterministic parameter init (torch.nn.Linear scheme:
        # uniform(-1/sqrt(fan_in), 1/sqrt(fan_in))).
        self.weights = []        # logical, transposed: (in, out), compute_dtype
        self.biases = []         # logical: (1, out), f32
        self._flat_params = []   # padded kernel params: [w1, b1, w2, b2, ...]
        in_dim = nodes_per_layer[0]
        for layer_num in range(1, n_layers):
            out_dim = nodes_per_layer[layer_num]
            out_pad = self.padded_dims[layer_num]
            # First layer keeps its logical K (input is fed unpadded); later
            # layers pad K to the previous layer's padded width with zero rows
            # (padded activation lanes are finite, so act(0)*0 == 0: harmless).
            in_pad = in_dim if layer_num == 1 else self.padded_dims[layer_num - 1]
            key, wk, bk = jax.random.split(key, 3)
            bound = 1.0 / (in_dim ** 0.5)
            w = jax.random.uniform(wk, (out_dim, in_dim), dtype=jnp.float32,
                                   minval=-bound, maxval=bound)
            b = jax.random.uniform(bk, (out_dim,), dtype=jnp.float32,
                                   minval=-bound, maxval=bound)
            w_t = jnp.asarray(w.T, dtype=compute_dtype)              # (in, out)
            b_row = jnp.asarray(b.reshape(1, out_dim), dtype=jnp.float32)
            self.weights.append(w_t)
            self.biases.append(b_row)
            w_pad = jnp.zeros((in_pad, out_pad), dtype=compute_dtype
                              ).at[:in_dim, :out_dim].set(w_t)
            b_pad = jnp.zeros((1, out_pad), dtype=jnp.float32
                              ).at[:, :out_dim].set(b_row)
            self._flat_params.extend([w_pad, b_pad])
            in_dim = out_dim

        # Fused path only if the resident parameters + minimal tiles fit VMEM
        # (worst case: 2 buffers per parameter).  Otherwise fall back to the
        # per-layer tiled path (implements the old TODO instead of asserting).
        self._use_buffered_params = True
        fused_fits = self._fused_vmem_estimate(_SUBLANE, param_buffers=2) <= self._vmem_budget
        self._use_fused = fused_fits and not force_layered
        self._forward = jax.jit(
            self._forward_fused_impl if self._use_fused else self._forward_layered_impl)

    # --- VMEM footprint estimates --------------------------------------------
    def _fused_vmem_estimate(self, tile_b: int, param_buffers: int) -> int:
        p_bytes = param_buffers * sum(int(p.size) * p.dtype.itemsize
                                      for p in self._flat_params)
        in_bytes = 2 * tile_b * self.nodes_per_layer[0] * 4
        out_bytes = 2 * tile_b * self.padded_dims[-1] * jnp.dtype(self.out_dtype).itemsize
        work_bytes = 4 * tile_b * max(self.padded_dims) * 4
        return p_bytes + in_bytes + out_bytes + work_bytes

    def _choose_fused_tile_b(self, batch: int) -> int:
        pbuf = 1 if self._use_buffered_params else 2
        b_al = _round_up(batch, _SUBLANE)
        tile_b = min(_MAX_TILE_B, b_al)
        # Keep >=2 grid steps when the batch allows it, so ("parallel",) can
        # shard the batch axis across v7x's two TensorCores.
        if b_al >= 2 * _SUBLANE:
            half = _round_up((b_al + 1) // 2, _SUBLANE)
            tile_b = min(tile_b, max(_SUBLANE, half))
        while (tile_b > _SUBLANE
               and self._fused_vmem_estimate(tile_b, pbuf) > self._vmem_budget):
            tile_b = max(_SUBLANE, _round_up(tile_b // 2, _SUBLANE))
        return tile_b

    # --- fused forward ---------------------------------------------------------
    def _forward_fused_impl(self, x: jax.Array, *params) -> jax.Array:
        B, D0 = x.shape
        dl_pad = self.padded_dims[-1]
        out_dim = self.nodes_per_layer[-1]

        tile_b = self._choose_fused_tile_b(B)
        grid = (pl.cdiv(B, tile_b),)

        kernel = _make_fused_mlp_kernel(self.activations, self.compute_dtype)

        # Input is fed unpadded (full logical last dim -> (8,128)-rule-safe);
        # the ragged final batch block is handled by Pallas masking.
        in_specs = [pl.BlockSpec((tile_b, D0), lambda i: (i, 0))]
        for w, b in zip(params[0::2], params[1::2]):
            # Grid-invariant index_map -> parameters stay VMEM-resident; with
            # Buffered(1) only one buffer is allocated per parameter.
            if self._use_buffered_params:
                in_specs.append(pl.BlockSpec(w.shape, lambda i: (0, 0),
                                             pipeline_mode=pl.Buffered(1)))
                in_specs.append(pl.BlockSpec(b.shape, lambda i: (0, 0),
                                             pipeline_mode=pl.Buffered(1)))
            else:
                in_specs.append(pl.BlockSpec(w.shape, lambda i: (0, 0)))
                in_specs.append(pl.BlockSpec(b.shape, lambda i: (0, 0)))
        out_specs = pl.BlockSpec((tile_b, dl_pad), lambda i: (i, 0))

        # Advisory cost estimate for XLA's scheduler.
        dims = [D0] + self.padded_dims[1:]
        flops = 2 * B * sum(dims[l] * dims[l + 1] for l in range(self.n_layers - 1))
        transcendentals = B * sum(
            self.padded_dims[l + 1]
            for l, a in enumerate(self.activations) if a in ("tanh", "sigmoid"))
        bytes_accessed = (B * D0 * x.dtype.itemsize
                          + sum(int(p.size) * p.dtype.itemsize for p in params)
                          + B * dl_pad * jnp.dtype(self.out_dtype).itemsize)

        fn = pl.pallas_call(
            kernel,
            out_shape=jax.ShapeDtypeStruct((B, dl_pad), self.out_dtype),
            grid=grid,
            in_specs=in_specs,
            out_specs=out_specs,
            compiler_params=pltpu.CompilerParams(
                dimension_semantics=("parallel",),
                vmem_limit_bytes=self._vmem_budget),
            cost_estimate=pl.CostEstimate(flops=int(flops),
                                          transcendentals=int(transcendentals),
                                          bytes_accessed=int(bytes_accessed)),
        )
        y = fn(x, *params)
        return y[:, :out_dim]

    # --- per-layer fallback (large fused footprints) ---------------------------
    def _layer_call(self, h, w, b, activation, o_dtype):
        B, K = h.shape
        N = w.shape[1]
        h_is = jnp.dtype(h.dtype).itemsize
        w_is = jnp.dtype(w.dtype).itemsize
        o_is = jnp.dtype(o_dtype).itemsize

        tn = _pick_div(N, (512, 256, 128))
        # Full K in one pass when the weight tile is small, else 128-aligned chunks.
        if K * tn * w_is <= 8 * 1024 * 1024:
            tk = K
        else:
            tk = _pick_div(K, (512, 256, 128))
        # TODO(synk): if even a (tk, tn) weight tile cannot fit VMEM, stream
        # K-chunks with pltpu.emit_pipeline instead of BlockSpec tiling.
        tile_b = min(512, _round_up(B, _SUBLANE))

        def est(tb):
            return (2 * tb * tk * h_is + 2 * tk * tn * w_is + 2 * tn * 4
                    + 2 * tb * tn * o_is + tb * tn * 4)

        while tile_b > _SUBLANE and est(tile_b) > self._vmem_budget:
            tile_b = max(_SUBLANE, _round_up(tile_b // 2, _SUBLANE))

        n_k = K // tk
        grid = (pl.cdiv(B, tile_b), N // tn, n_k)
        kernel = _make_layer_kernel(activation, self.compute_dtype)
        return pl.pallas_call(
            kernel,
            out_shape=jax.ShapeDtypeStruct((B, N), o_dtype),
            grid=grid,
            in_specs=[
                pl.BlockSpec((tile_b, tk), lambda i, j, k: (i, k)),
                pl.BlockSpec((tk, tn), lambda i, j, k: (k, j)),
                pl.BlockSpec((1, tn), lambda i, j, k: (0, j)),
            ],
            out_specs=pl.BlockSpec((tile_b, tn), lambda i, j, k: (i, j)),
            scratch_shapes=[pltpu.VMEM((tile_b, tn), jnp.float32)],
            compiler_params=pltpu.CompilerParams(
                dimension_semantics=("parallel", "parallel", "arbitrary"),
                vmem_limit_bytes=self._vmem_budget),
        )(h, w, b)

    def _forward_layered_impl(self, x: jax.Array, *params) -> jax.Array:
        h = x
        n_lin = self.n_layers - 1
        for idx in range(n_lin):
            w, b = params[2 * idx], params[2 * idx + 1]
            is_last = idx == n_lin - 1
            o_dt = self.out_dtype if is_last else self.compute_dtype
            h = self._layer_call(h, w, b, self.activations[idx], o_dt)
        return h[:, :self.nodes_per_layer[-1]]

    # --- public API -------------------------------------------------------------
    def __call__(self, x: jax.Array) -> jax.Array:
        assert x.ndim == 2 and x.shape[1] == self.nodes_per_layer[0]
        try:
            return self._forward(x, *self._flat_params)
        except Exception:
            # Fallback if this Pallas build rejects pipeline_mode=pl.Buffered(1)
            # on the grid-invariant parameter BlockSpecs.
            if self._use_fused and self._use_buffered_params:
                self._use_buffered_params = False
                self._forward = jax.jit(self._forward_fused_impl)
                return self._forward(x, *self._flat_params)
            raise


# --- pure-JAX reference for correctness check --------------------------------
def _reference_forward(net: GenericFeedForwardNetworkPallas, x: jax.Array):
    h = x.astype(jnp.float32)
    for act, w, b in zip(net.activations, net.weights, net.biases):
        h = h @ w.astype(jnp.float32) + b.astype(jnp.float32)
        h = _ACTIVATIONS[act](h)
    return h.astype(net.out_dtype)


if __name__ == "__main__":
    key = jax.random.PRNGKey(0)
    key, xkey, pkey = jax.random.split(key, 3)

    # Configuration: n_layers=3, nodes=[32, 64, 16], activations=['relu','tanh']
    n_layers = 3
    nodes_per_layer = [32, 64, 16]
    activations = ["relu", "tanh"]

    # 1) f32 fused path, tiny batch (tight tolerance vs reference)
    net_f32 = GenericFeedForwardNetworkPallas(
        n_layers, activations, nodes_per_layer, key=pkey,
        compute_dtype=jnp.float32)
    x_small = jax.random.normal(xkey, (8, nodes_per_layer[0]), dtype=jnp.float32)
    out = jax.block_until_ready(net_f32(x_small))
    ref = _reference_forward(net_f32, x_small)
    assert out.shape == (8, nodes_per_layer[-1])
    assert jnp.allclose(out, ref, atol=1e-5, rtol=1e-5), "f32 mismatch vs reference"

    # 2) default bf16-fed fused path, batch large enough for a multi-step grid
    net_bf16 = GenericFeedForwardNetworkPallas(
        n_layers, activations, nodes_per_layer, key=pkey)
    x_big = jax.random.normal(xkey, (300, nodes_per_layer[0]), dtype=jnp.float32)
    out2 = jax.block_until_ready(net_bf16(x_big))
    ref2 = _reference_forward(net_bf16, x_big)
    assert out2.shape == (300, nodes_per_layer[-1])
    assert jnp.allclose(out2, ref2, atol=5e-2, rtol=5e-2), "bf16 mismatch vs reference"

    # 3) per-layer tiled fallback path (forced), f32 for a tight check
    net_layered = GenericFeedForwardNetworkPallas(
        n_layers, activations, nodes_per_layer, key=pkey,
        compute_dtype=jnp.float32, force_layered=True)
    x_mid = jax.random.normal(xkey, (20, nodes_per_layer[0]), dtype=jnp.float32)
    out3 = jax.block_until_ready(net_layered(x_mid))
    ref3 = _reference_forward(net_layered, x_mid)
    assert out3.shape == (20, nodes_per_layer[-1])
    assert jnp.allclose(out3, ref3, atol=1e-5, rtol=1e-5), "layered mismatch vs reference"

    print("KERNEL_OK")
</pallas_src>

<mosaic_0001>
module attributes {stable_mosaic.version = 11 : i64} {
  func.func @kernel(%arg0: i32, %arg1: memref<8x32xf32, #tpu.memory_space<vmem>>, %arg2: memref<32x128xf32, #tpu.memory_space<vmem>>, %arg3: memref<1x128xf32, #tpu.memory_space<vmem>>, %arg4: memref<128x128xf32, #tpu.memory_space<vmem>>, %arg5: memref<1x128xf32, #tpu.memory_space<vmem>>, %arg6: memref<8x128xf32, #tpu.memory_space<vmem>>) attributes {dimension_semantics = [#tpu.dimension_semantics<parallel>], iteration_bounds = array<i64: 1>, scalar_prefetch = 0 : i64, scratch_operands = 0 : i64, tpu.core_type = #tpu.core_type<tc>, window_params = [{transform_indices = @transform_0, window_bounds = array<i64: 8, 32>}, {pipeline_mode = #tpu.pipeline_mode<synchronous>, transform_indices = @transform_1, window_bounds = array<i64: 32, 128>}, {pipeline_mode = #tpu.pipeline_mode<synchronous>, transform_indices = @transform_2, window_bounds = array<i64: 1, 128>}, {pipeline_mode = #tpu.pipeline_mode<synchronous>, transform_indices = @transform_3, window_bounds = array<i64: 128, 128>}, {pipeline_mode = #tpu.pipeline_mode<synchronous>, transform_indices = @transform_4, window_bounds = array<i64: 1, 128>}, {transform_indices = @transform_5, window_bounds = array<i64: 8, 128>}]} {
    %c0 = arith.constant 0 : index
    %c0_0 = arith.constant 0 : index
    %0 = vector.load %arg1[%c0, %c0_0] : memref<8x32xf32, #tpu.memory_space<vmem>>, vector<8x32xf32>
    %c0_1 = arith.constant 0 : index
    %c0_2 = arith.constant 0 : index
    %1 = vector.load %arg2[%c0_1, %c0_2] : memref<32x128xf32, #tpu.memory_space<vmem>>, vector<32x128xf32>
    %cst = arith.constant dense<0.000000e+00> : vector<8x128xf32>
    %2 = tpu.matmul %0, %1, %cst {dimension_numbers = #tpu.dot_dimension_numbers<[1], [0], [0], [1], [0, 0, 1, 1], [], []>} : vector<8x32xf32>, vector<32x128xf32>, vector<8x128xf32> -> vector<8x128xf32>
    %c0_3 = arith.constant 0 : index
    %c0_4 = arith.constant 0 : index
    %3 = vector.load %arg3[%c0_3, %c0_4] : memref<1x128xf32, #tpu.memory_space<vmem>>, vector<1x128xf32>
    %4 = vector.broadcast %3 : vector<1x128xf32> to vector<8x128xf32>
    %5 = arith.addf %2, %4 : vector<8x128xf32>
    %cst_5 = arith.constant 0.000000e+00 : f32
    %6 = vector.broadcast %cst_5 : f32 to vector<8x128xf32>
    %7 = arith.maximumf %5, %6 : vector<8x128xf32>
    %c0_6 = arith.constant 0 : index
    %c0_7 = arith.constant 0 : index
    %8 = vector.load %arg4[%c0_6, %c0_7] : memref<128x128xf32, #tpu.memory_space<vmem>>, vector<128x128xf32>
    %cst_8 = arith.constant dense<0.000000e+00> : vector<8x128xf32>
    %9 = tpu.matmul %7, %8, %cst_8 {dimension_numbers = #tpu.dot_dimension_numbers<[1], [0], [0], [1], [0, 0, 1, 1], [], []>} : vector<8x128xf32>, vector<128x128xf32>, vector<8x128xf32> -> vector<8x128xf32>
    %c0_9 = arith.constant 0 : index
    %c0_10 = arith.constant 0 : index
    %10 = vector.load %arg5[%c0_9, %c0_10] : memref<1x128xf32, #tpu.memory_space<vmem>>, vector<1x128xf32>
    %11 = vector.broadcast %10 : vector<1x128xf32> to vector<8x128xf32>
    %12 = arith.addf %9, %11 : vector<8x128xf32>
    %13 = math.tanh %12 : vector<8x128xf32>
    %c0_11 = arith.constant 0 : index
    %c0_12 = arith.constant 0 : index
    %14 = vector.load %arg6[%c0_11, %c0_12] : memref<8x128xf32, #tpu.memory_space<vmem>>, vector<8x128xf32>
    tpu.vector_store %arg6[%c0_11, %c0_12], %13 {strides = array<i32>} : memref<8x128xf32, #tpu.memory_space<vmem>>, vector<8x128xf32>,
    return
  }
  func.func @transform_0(%arg0: i32) -> (i32, i32) {
    %c0_i32 = arith.constant 0 : i32
    %c0_i32_0 = arith.constant 0 : i32
    return %arg0, %c0_i32 : i32, i32
  }
  func.func @transform_1(%arg0: i32) -> (i32, i32) {
    %c0_i32 = arith.constant 0 : i32
    %c0_i32_0 = arith.constant 0 : i32
    %c0_i32_1 = arith.constant 0 : i32
    return %c0_i32, %c0_i32_0 : i32, i32
  }
  func.func @transform_2(%arg0: i32) -> (i32, i32) {
    %c0_i32 = arith.constant 0 : i32
    %c0_i32_0 = arith.constant 0 : i32
    %c0_i32_1 = arith.constant 0 : i32
    return %c0_i32, %c0_i32_0 : i32, i32
  }
  func.func @transform_3(%arg0: i32) -> (i32, i32) {
    %c0_i32 = arith.constant 0 : i32
    %c0_i32_0 = arith.constant 0 : i32
    %c0_i32_1 = arith.constant 0 : i32
    return %c0_i32, %c0_i32_0 : i32, i32
  }
  func.func @transform_4(%arg0: i32) -> (i32, i32) {
    %c0_i32 = arith.constant 0 : i32
    %c0_i32_0 = arith.constant 0 : i32
    %c0_i32_1 = arith.constant 0 : i32
    return %c0_i32, %c0_i32_0 : i32, i32
  }
  func.func @transform_5(%arg0: i32) -> (i32, i32) {
    %c0_i32 = arith.constant 0 : i32
    %c0_i32_0 = arith.constant 0 : i32
    return %arg0, %c0_i32 : i32, i32
  }
}

</mosaic_0001>

<bundles_post_ra>
// kernel: _forward_fused_impl.1
= control target key start
LH: loop header
LB: loop body
LE: loop exit
PB: predicated region body
PF: predicated region fallthrough
CT: control target
= control target key end

     0   :  { %10 = vsyncpa [#allocation3], 0  ;;  %s503_s0 = inlined_call_operand.hbm [shape: f32[8,32], index: 0, kind: input, shape index: {}]   ;;  %s504_s1 = inlined_call_operand.hbm [shape: f32[32,128], index: 1, kind: input, shape index: {}]   ;;  %s505_s2 = inlined_call_operand.vmem [shape: f32[1,128], index: 2, kind: input, shape index: {}]   ;;  %s506_s3 = inlined_call_operand.hbm [shape: f32[128,128], index: 3, kind: input, shape index: {}]   ;;  %s507_s4 = inlined_call_operand.vmem [shape: f32[1,128], index: 4, kind: input, shape index: {}]   ;;  %s508_s5 = inlined_call_operand.hbm [shape: f32[8,128], index: 5, kind: output, shape index: {}]  }
   0x1   :  { %11 = vsyncpa [#allocation6], 0 }
   0x2   :  { %12 = vsyncpa [#allocation4], 0  ;;  %s425_s18 = smov [#allocation5]  }
   0x3   :  { %s28_s19 = sshll.u32 %s425_s18, 4  ;;  %s29_s19 = int_to_ptr.vmem [resolvable:$true] %s28_s19 }
   0x4   :  { %s347_s20 = scalar_lea.vmem %s29_s19, 512  ;;  %p352_p1 = scmp.lt.s32.totalorder %s29_s19, %s29_s19 }
   0x5   :  { %p348_p0 = scmp.ne.s32.totalorder %s29_s19, %s347_s20  ;;  %p353_p2 = scmp.lt.s32.totalorder %s347_s20, %s347_s20 }
   0x7   :  { %p354_p3 = por %p353_p2, %p352_p1 }
   0x9   :  { %p355_p4 = pnand %p354_p3, %p348_p0 }
   0xb   :  { %358 = shalt.err (!%p355_p4)
}
   0xc   :  { %s426_s21 = smov 128   ;;  %s427_s22 = smov 8  }
   0xd   :  { %34 = dma.hbm_to_vmem [thread:$0]  %s504_s1, 512, %s29_s19, [#allocation6], %s426_s21, %s426_s21, %s427_s22  }
   0xe   :  { %s428_s25 = smov [#allocation2]   ;;  %s429_s27 = smov [#allocation7]  }
   0xf   :  { %s19_s26 = sshll.u32 %s428_s25, 4  ;;  %s42_s28 = sshll.u32 %s429_s27, 4  ;;  %s20_s26 = int_to_ptr.vmem [resolvable:$true] %s19_s26  ;;  %s43_s28 = int_to_ptr.vmem [resolvable:$true] %s42_s28 }
  0x10   :  { %s367_s29 = scalar_lea.vmem %s20_s26, 128  ;;  %p372_p6 = scmp.lt.s32.totalorder %s20_s26, %s20_s26 }
  0x11   :  { %p368_p5 = scmp.ne.s32.totalorder %s20_s26, %s367_s29  ;;  %p373_p7 = scmp.lt.s32.totalorder %s367_s29, %s367_s29 }
  0x13   :  { %p374_p8 = por %p373_p7, %p372_p6 }
  0x15   :  { %p375_p9 = pnand %p374_p8, %p368_p5 }
  0x17   :  { %378 = shalt.err (!%p375_p9)
}
  0x18   :  { %22 = dma.hbm_to_vmem [thread:$0]  %s503_s0, 128, %s20_s26, [#allocation3]  }
  0x19   :  { %s387_s7 = scalar_lea.vmem %s43_s28, 2048  ;;  %p392_p11 = scmp.lt.s32.totalorder %s43_s28, %s43_s28 }
  0x1a   :  { %p388_p10 = scmp.ne.s32.totalorder %s43_s28, %s387_s7  ;;  %p393_p12 = scmp.lt.s32.totalorder %s387_s7, %s387_s7 }
  0x1c   :  { %p394_p13 = por %p393_p12, %p392_p11 }
  0x1e   :  { %p395_p0 = pnand %p394_p13, %p388_p10 }
  0x20   :  { %398 = shalt.err (!%p395_p0)
}
  0x21   :  { %48 = dma.hbm_to_vmem [thread:$0]  %s506_s3, 2048, %s43_s28, [#allocation6], %s426_s21, %s426_s21, %s427_s22  }
  0x22   :  { %419 = dma.done.wait [#allocation3], 128  }
  0x23   :  { %420 = vsyncadd [#allocation3], 4294967168 }
  0x24   :  { %421 = dma.done.wait [#allocation6], 2560  }
  0x25   :  { %422 = vsyncadd [#allocation6], 4294964736  ;;  %v430_v0 = vmov 0.0   ;;  %vm431_vm0 = vmmov 0   ;;  %v64_v1 = vld [vmem:[#allocation5 + $0x18] sm:$0xff]  ;;  %v63_v2 = vld [vmem:[#allocation5 + $0x10] sm:$0xff] }
  0x26   :  { %283 = vmatprep.subr.mxu0 %v430_v0  ;;  %291 = vmatprep.mubr.msk.f32.mxu0 %vm431_vm0, %v430_v0  ;;  %v162_v3 = vld [vmem:[#allocation7 + $0x78] sm:$0xff]  ;;  %v62_v4 = vld [vmem:[#allocation5 + $0x8] sm:$0xff]  ;;  %v161_v5 = vld [vmem:[#allocation7 + $0x70] sm:$0xff]  ;;  %vm72_vm1 = vcmask 261120   ;;  %s432_s11 = smov [#allocation8]  }
  0x27   :  { %294 = vmatprep.subr.mxu1 %v430_v0  ;;  %326 = vmatprep.mubr.msk.f32.mxu1 %vm431_vm0, %v430_v0  ;;  %v160_v6 = vld [vmem:[#allocation7 + $0x68] sm:$0xff]  ;;  %v61_v7 = vld [vmem:[#allocation5] sm:$0xff]  ;;  %v60_v8 = vld [vmem:[#allocation2] sm:$0xff]  ;;  %s248_s12 = sshll.u32 %s432_s11, 4  ;;  %s249_s12 = int_to_ptr.vmem [resolvable:$true] %s248_s12 }
  0x28   :  { %284 = vmatpush3.msra.mxu0 %v64_v1  ;;  %295 = vmatpush3.msra.mxu1 %v162_v3  ;;  %v159_v9 = vld [vmem:[#allocation7 + $0x60] sm:$0xff]  ;;  %v158_v10 = vld [vmem:[#allocation7 + $0x58] sm:$0xff]  ;;  %v157_v11 = vld [vmem:[#allocation7 + $0x50] sm:$0xff]  ;;  %s399_s13 = scalar_lea.vmem %s249_s12, 128  ;;  %p404_p2 = scmp.lt.s32.totalorder %s249_s12, %s249_s12 }
  0x29   :  { %285 = vmatprep.subr.mxu0 %v430_v0  ;;  %296 = vmatprep.subr.mxu1 %v430_v0  ;;  %v156_v12 = vld [vmem:[#allocation7 + $0x48] sm:$0xff]  ;;  %v155_v13 = vld [vmem:[#allocation7 + $0x40] sm:$0xff]  ;;  %v154_v14 = vld [vmem:[#allocation7 + $0x38] sm:$0xff]  ;;  %p400_p1 = scmp.ne.s32.totalorder %s249_s12, %s399_s13  ;;  %p405_p3 = scmp.lt.s32.totalorder %s399_s13, %s399_s13 }
  0x2a   :  { %286 = vmatpush3.msra.mxu0 %v63_v2  ;;  %297 = vmatpush3.msra.mxu1 %v161_v5  ;;  %v153_v15 = vld [vmem:[#allocation7 + $0x30] sm:$0xff]  ;;  %v152_v16 = vld [vmem:[#allocation7 + $0x28] sm:$0xff]  ;;  %v151_v17 = vld [vmem:[#allocation7 + $0x20] sm:$0xff] }
  0x2b   :  { %287 = vmatprep.subr.mxu0 %v430_v0  ;;  %298 = vmatprep.subr.mxu1 %v430_v0  ;;  %v150_v18 = vld [vmem:[#allocation7 + $0x18] sm:$0xff]  ;;  %v149_v19 = vld [vmem:[#allocation7 + $0x10] sm:$0xff]  ;;  %v148_v20 = vld [vmem:[#allocation7 + $0x8] sm:$0xff]  ;;  %p406_p4 = por %p405_p3, %p404_p2 }
  0x2c   :  { %288 = vmatpush3.msra.mxu0 %v62_v4  ;;  %299 = vmatpush3.msra.mxu1 %v160_v6  ;;  %v147_v21 = vld [vmem:[#allocation7] sm:$0xff]  ;;  %v258_v22 = vld [vmem:[%s505_s2] ss:$0 sm:$0xff] }
  0x2d   :  { %289 = vmatprep.subr.mxu0 %v430_v0  ;;  %300 = vmatprep.subr.mxu1 %v430_v0  ;;  %v260_v27 = vld [vmem:[%s507_s4] ss:$0 sm:$0xff]  ;;  %p407_p5 = pnand %p406_p4, %p400_p1 }
  0x2e   :  { %290 = vmatpush3.msra.mxu0 %v61_v7  ;;  %301 = vmatpush3.msra.mxu1 %v159_v9 }
  0x2f   :  { %292 = vmatmul.mubr.msk.f32.vlgmr.msra.gmra.mxu0 %vm72_vm1, %v60_v8  ;;  %302 = vmatprep.subr.mxu1 %v430_v0 }
  0x30   :  { %303 = vmatpush3.msra.mxu1 %v158_v10 }
  0x31   :  { %304 = vmatprep.subr.mxu1 %v430_v0 }
  0x32   :  { %305 = vmatpush3.msra.mxu1 %v157_v11 }
  0x33   :  { %306 = vmatprep.subr.mxu1 %v430_v0 }
  0x34   :  { %307 = vmatpush3.msra.mxu1 %v156_v12 }
  0x35   :  { %308 = vmatprep.subr.mxu1 %v430_v0 }
  0x36   :  { %309 = vmatpush3.msra.mxu1 %v155_v13 }
  0x37   :  { %310 = vmatprep.subr.mxu1 %v430_v0 }
  0x38   :  { %311 = vmatpush3.msra.mxu1 %v154_v14 }
  0x39   :  { %312 = vmatprep.subr.mxu1 %v430_v0 }
  0x3a   :  { %313 = vmatpush3.msra.mxu1 %v153_v15 }
  0x3b   :  { %314 = vmatprep.subr.mxu1 %v430_v0 }
  0x3c   :  { %315 = vmatpush3.msra.mxu1 %v152_v16 }
  0x3d   :  { %316 = vmatprep.subr.mxu1 %v430_v0 }
  0x3e   :  { %317 = vmatpush3.msra.mxu1 %v151_v17 }
  0x3f   :  { %318 = vmatprep.subr.mxu1 %v430_v0 }
  0x40   :  { %319 = vmatpush3.msra.mxu1 %v150_v18 }
  0x41   :  { %320 = vmatprep.subr.mxu1 %v430_v0 }
  0x42   :  { %321 = vmatpush3.msra.mxu1 %v149_v19 }
  0x43   :  { %322 = vmatprep.subr.mxu1 %v430_v0 }
  0x44   :  { %323 = vmatpush3.msra.mxu1 %v148_v20 }
  0x45   :  { %324 = vmatprep.subr.mxu1 %v430_v0 }
  0x46   :  { %325 = vmatpush3.msra.mxu1 %v147_v21 }
  0xef   :  { %v142_v23 = vpop.f32.mrf.mxu0 }
  0xf0   :  { %v143_v24 = vadd.f32 %v258_v22, %v142_v23 }
  0xf1   :  { %v293_v25 = vpop.f32.mrf.mxu0 }
  0xf2   :  { %v146_v26 = vmax.f32 %v143_v24, 0.0 }
  0xf4   :  { %327 = vmatmul.mubr.f32.vlgmr.msra.gmra.mxu1 %v146_v26 }
 0x1b4   :  { %v236_v28 = vpop.f32.mrf.mxu1 }
 0x1b5   :  { %v237_v29 = vadd.f32 %v260_v27, %v236_v28 }
 0x1b6   :  { %v328_v30 = vpop.f32.mrf.mxu1 }
 0x1b7   :  { %337 = vtanh.f32 %v237_v29 }
 0x1c4   :  { %v338_v31 = vpop.eup %337 }
 0x1c5   :  { %241 = vst [vmem:[#allocation8] sm:$0xff] %v338_v31 }
 0x1c6   :  { %410 = shalt.err (!%p407_p5)
}
 0x1c7   :  { %251 = dma.vmem_to_hbm [thread:$0]  %s249_s12, 128, %s508_s5, [#allocation4]  }
 0x1c8   :  { %423 = dma.done.wait [#allocation4], 128  }
 0x1c9   :  { %424 = vsyncadd [#allocation4], 4294967168 }
 0x1ca   :  { %255 = vsyncpa [#allocation3], 1 }
 0x1cb   :  { %256 = vsyncpa [#allocation6], 1 }
 0x1cc   :  { %257 = vsyncpa [#allocation4], 1 }

</bundles_post_ra>
